<compile_context>
chip_gen: v7x
topology: tpu7x:2x2x1
jax: 0.10.0
libtpu: 0.0.40
codegen_flags: <defaults>
</compile_context>

<pallas_src>
import math

import jax
import jax.numpy as jnp
from jax.experimental import pallas as pl
from jax.experimental.pallas import tpu as pltpu

Z_DIM = 10
RECON = 784
RECON_PAD = 896  # 7 * 128 -> lane-dense output stores
ENC_DIMS = [(784, 80), (80, 40), (40, 20), (20, 2 * Z_DIM)]
DEC_DIMS = [(Z_DIM, 20), (20, 40), (40, 80), (80, 784)]

TB_MAX = 1024  # batch tile; conservative for v7x's 64 MiB VMEM, fine on v5e/v6e


def _round_up(n, m):
    return ((n + m - 1) // m) * m


def vae_forward_kernel(x_ref, eps_ref,
                       we0, be0, we1, be1, we2, be2,
                       wmu, bmu, wlv, blv,
                       wd0, bd0, wd1, bd1, wd2, bd2, wd3, bd3,
                       recon_ref, mu_ref, logvar_ref):
    f32 = jnp.float32
    bf16 = jnp.bfloat16

    # ---- encoder: 3x (Linear + ReLU), then split final Linear into mu / logvar ----
    h = x_ref[...]                                                           # (TB, 784) bf16
    h = jnp.maximum(jnp.dot(h, we0[...], preferred_element_type=f32) + be0[...], 0.0)
    h = jnp.maximum(jnp.dot(h.astype(bf16), we1[...], preferred_element_type=f32) + be1[...], 0.0)
    h = jnp.maximum(jnp.dot(h.astype(bf16), we2[...], preferred_element_type=f32) + be2[...], 0.0)
    hb = h.astype(bf16)
    mu = jnp.dot(hb, wmu[...], preferred_element_type=f32) + bmu[...]        # (TB, 10)
    logvar = jnp.dot(hb, wlv[...], preferred_element_type=f32) + blv[...]    # (TB, 10)

    # ---- reparameterize (eps supplied from outside for determinism) ----
    z = mu + eps_ref[...] * jnp.exp(0.5 * logvar)                            # (TB, 10) f32

    # ---- decoder: 3x (Linear + ReLU), final Linear (no activation, padded to 896) ----
    d = jnp.maximum(jnp.dot(z.astype(bf16), wd0[...], preferred_element_type=f32) + bd0[...], 0.0)
    d = jnp.maximum(jnp.dot(d.astype(bf16), wd1[...], preferred_element_type=f32) + bd1[...], 0.0)
    d = jnp.maximum(jnp.dot(d.astype(bf16), wd2[...], preferred_element_type=f32) + bd2[...], 0.0)
    recon = jnp.dot(d.astype(bf16), wd3[...], preferred_element_type=f32) + bd3[...]  # (TB, 896)

    recon_ref[...] = recon
    mu_ref[...] = mu
    logvar_ref[...] = logvar


def _prepare_params(enc_params, dec_params):
    """bf16 weights, f32 (1,N) biases; split final encoder layer; pad final decoder to 896."""
    (we0, be0), (we1, be1), (we2, be2), (we3, be3) = enc_params
    (wd0, bd0), (wd1, bd1), (wd2, bd2), (wd3, bd3) = dec_params

    def wb(w, b):
        return w.astype(jnp.bfloat16), b.astype(jnp.float32).reshape(1, -1)

    # Split must match dist[:, :10] / dist[:, 10:] column order exactly.
    be3f = be3.reshape(-1)
    wmu, bmu = we3[:, :Z_DIM], be3f[:Z_DIM]
    wlv, blv = we3[:, Z_DIM:], be3f[Z_DIM:]

    # Zero-pad final decoder layer 784 -> 896 output columns (padded cols never leak:
    # weight cols and bias entries 784: are exactly zero and are sliced off outside).
    wd3p = jnp.zeros((wd3.shape[0], RECON_PAD), jnp.float32).at[:, :RECON].set(wd3)
    bd3p = jnp.zeros((RECON_PAD,), jnp.float32).at[:RECON].set(bd3.reshape(-1))

    flat = []
    for w, b in [(we0, be0), (we1, be1), (we2, be2),
                 (wmu, bmu), (wlv, blv),
                 (wd0, bd0), (wd1, bd1), (wd2, bd2), (wd3p, bd3p)]:
        flat += list(wb(w, b))
    return flat


def beta_vae_forward(x, eps, enc_params, dec_params, *, tb_max=TB_MAX):
    """x: (B, 1, 28, 28), eps: (B, z_dim). Returns (recon (B,1,28,28), mu, logvar) in f32."""
    B = x.shape[0]
    x_flat = x.reshape(B, RECON).astype(jnp.float32)
    eps = eps.astype(jnp.float32)

    # Batch tile: multiple of 16 (bf16 sublane packing); pad B up to a multiple of tb.
    tb = min(tb_max, _round_up(B, 16))
    Bp = _round_up(B, tb)
    if Bp != B:
        x_flat = jnp.pad(x_flat, ((0, Bp - B), (0, 0)))
        eps = jnp.pad(eps, ((0, Bp - B), (0, 0)))
    x_bf = x_flat.astype(jnp.bfloat16)

    params = _prepare_params(enc_params, dec_params)

    grid = (Bp // tb,)
    in_specs = [pl.BlockSpec((tb, RECON), lambda i: (i, 0)),     # x tile
                pl.BlockSpec((tb, Z_DIM), lambda i: (i, 0))]     # eps tile
    # Weights / biases: constant index_map -> resident in VMEM, DMA'd once.
    in_specs += [pl.BlockSpec(p.shape, lambda i: (0, 0)) for p in params]

    out_shape = (
        jax.ShapeDtypeStruct((Bp, RECON_PAD), jnp.float32),
        jax.ShapeDtypeStruct((Bp, Z_DIM), jnp.float32),
        jax.ShapeDtypeStruct((Bp, Z_DIM), jnp.float32),
    )
    out_specs = (
        pl.BlockSpec((tb, RECON_PAD), lambda i: (i, 0)),
        pl.BlockSpec((tb, Z_DIM), lambda i: (i, 0)),
        pl.BlockSpec((tb, Z_DIM), lambda i: (i, 0)),
    )

    recon_p, mu, logvar = pl.pallas_call(
        vae_forward_kernel,
        grid=grid,
        in_specs=in_specs,
        out_specs=out_specs,
        out_shape=out_shape,
        compiler_params=pltpu.CompilerParams(
            dimension_semantics=("parallel",),   # batch axis shards across TCs on v7x
            vmem_limit_bytes=48 << 20,
        ),
    )(x_bf, eps, *params)

    recon = recon_p[:B, :RECON].reshape(B, 1, 28, 28)
    return recon, mu[:B], logvar[:B]


def init_linear(key, fan_in, fan_out):
    """Kaiming-normal init (mode=fan_in, gain=sqrt(2)), bias = 0, like kaiming_init."""
    std = math.sqrt(2.0 / fan_in)
    w = std * jax.random.normal(key, (fan_in, fan_out), dtype=jnp.float32)
    b = jnp.zeros((fan_out,), dtype=jnp.float32)
    return w, b


def reference_forward(x, eps, enc_params, dec_params):
    """Pure-JAX reference with the same bf16-operand / f32-accumulate matmul math."""
    bf16, f32 = jnp.bfloat16, jnp.float32
    B = x.shape[0]

    def lin(h, w, b):
        return (jnp.dot(h.astype(bf16), w.astype(bf16), preferred_element_type=f32)
                + b.reshape(1, -1).astype(f32))

    h = x.reshape(B, RECON)
    for i, (w, b) in enumerate(enc_params):
        h = lin(h, w, b)
        if i < len(enc_params) - 1:
            h = jnp.maximum(h, 0.0)
    mu, logvar = h[:, :Z_DIM], h[:, Z_DIM:]
    z = mu + eps * jnp.exp(0.5 * logvar)
    d = z
    for i, (w, b) in enumerate(dec_params):
        d = lin(d, w, b)
        if i < len(dec_params) - 1:
            d = jnp.maximum(d, 0.0)
    return d.reshape(B, 1, 28, 28), mu, logvar


if __name__ == "__main__":
    key = jax.random.PRNGKey(0)
    keys = jax.random.split(key, 2 + len(ENC_DIMS) + len(DEC_DIMS))

    enc_params = [init_linear(keys[i], fi, fo) for i, (fi, fo) in enumerate(ENC_DIMS)]
    dec_params = [init_linear(keys[len(ENC_DIMS) + i], fi, fo)
                  for i, (fi, fo) in enumerate(DEC_DIMS)]

    B = 2
    x = jax.random.normal(keys[-2], (B, 1, 28, 28), dtype=jnp.float32)
    # eps plays the role of torch.randn_like(std) in reparameterize.
    eps = jax.random.normal(keys[-1], (B, Z_DIM), dtype=jnp.float32)

    recon, mu, logvar = beta_vae_forward(x, eps, enc_params, dec_params)
    jax.block_until_ready((recon, mu, logvar))

    assert recon.shape == (B, 1, 28, 28)
    assert mu.shape == (B, Z_DIM) and logvar.shape == (B, Z_DIM)

    r_ref, mu_ref, lv_ref = reference_forward(x, eps, enc_params, dec_params)
    assert jnp.allclose(recon, r_ref, rtol=2e-2, atol=2e-2)
    assert jnp.allclose(mu, mu_ref, rtol=2e-2, atol=2e-2)
    assert jnp.allclose(logvar, lv_ref, rtol=2e-2, atol=2e-2)
    assert bool(jnp.all(jnp.isfinite(recon)))
    assert bool(jnp.all(jnp.isfinite(mu))) and bool(jnp.all(jnp.isfinite(logvar)))

    print("KERNEL_OK")
</pallas_src>

<mosaic_0001>
module attributes {stable_mosaic.version = 11 : i64} {
  func.func @vae_forward_kernel(%arg0: i32, %arg1: memref<16x784xbf16, #tpu.memory_space<vmem>>, %arg2: memref<16x10xf32, #tpu.memory_space<vmem>>, %arg3: memref<784x80xbf16, #tpu.memory_space<vmem>>, %arg4: memref<1x80xf32, #tpu.memory_space<vmem>>, %arg5: memref<80x40xbf16, #tpu.memory_space<vmem>>, %arg6: memref<1x40xf32, #tpu.memory_space<vmem>>, %arg7: memref<40x20xbf16, #tpu.memory_space<vmem>>, %arg8: memref<1x20xf32, #tpu.memory_space<vmem>>, %arg9: memref<20x10xbf16, #tpu.memory_space<vmem>>, %arg10: memref<1x10xf32, #tpu.memory_space<vmem>>, %arg11: memref<20x10xbf16, #tpu.memory_space<vmem>>, %arg12: memref<1x10xf32, #tpu.memory_space<vmem>>, %arg13: memref<10x20xbf16, #tpu.memory_space<vmem>>, %arg14: memref<1x20xf32, #tpu.memory_space<vmem>>, %arg15: memref<20x40xbf16, #tpu.memory_space<vmem>>, %arg16: memref<1x40xf32, #tpu.memory_space<vmem>>, %arg17: memref<40x80xbf16, #tpu.memory_space<vmem>>, %arg18: memref<1x80xf32, #tpu.memory_space<vmem>>, %arg19: memref<80x896xbf16, #tpu.memory_space<vmem>>, %arg20: memref<1x896xf32, #tpu.memory_space<vmem>>, %arg21: memref<16x896xf32, #tpu.memory_space<vmem>>, %arg22: memref<16x10xf32, #tpu.memory_space<vmem>>, %arg23: memref<16x10xf32, #tpu.memory_space<vmem>>) attributes {dimension_semantics = [#tpu.dimension_semantics<parallel>], iteration_bounds = array<i64: 1>, scalar_prefetch = 0 : i64, scratch_operands = 0 : i64, tpu.core_type = #tpu.core_type<tc>, window_params = [{transform_indices = @transform_0, window_bounds = array<i64: 16, 784>}, {transform_indices = @transform_1, window_bounds = array<i64: 16, 10>}, {pipeline_mode = #tpu.pipeline_mode<synchronous>, transform_indices = @transform_2, window_bounds = array<i64: 784, 80>}, {pipeline_mode = #tpu.pipeline_mode<synchronous>, transform_indices = @transform_3, window_bounds = array<i64: 1, 80>}, {pipeline_mode = #tpu.pipeline_mode<synchronous>, transform_indices = @transform_4, window_bounds = array<i64: 80, 40>}, {pipeline_mode = #tpu.pipeline_mode<synchronous>, transform_indices = @transform_5, window_bounds = array<i64: 1, 40>}, {pipeline_mode = #tpu.pipeline_mode<synchronous>, transform_indices = @transform_6, window_bounds = array<i64: 40, 20>}, {pipeline_mode = #tpu.pipeline_mode<synchronous>, transform_indices = @transform_7, window_bounds = array<i64: 1, 20>}, {pipeline_mode = #tpu.pipeline_mode<synchronous>, transform_indices = @transform_8, window_bounds = array<i64: 20, 10>}, {pipeline_mode = #tpu.pipeline_mode<synchronous>, transform_indices = @transform_9, window_bounds = array<i64: 1, 10>}, {pipeline_mode = #tpu.pipeline_mode<synchronous>, transform_indices = @transform_10, window_bounds = array<i64: 20, 10>}, {pipeline_mode = #tpu.pipeline_mode<synchronous>, transform_indices = @transform_11, window_bounds = array<i64: 1, 10>}, {pipeline_mode = #tpu.pipeline_mode<synchronous>, transform_indices = @transform_12, window_bounds = array<i64: 10, 20>}, {pipeline_mode = #tpu.pipeline_mode<synchronous>, transform_indices = @transform_13, window_bounds = array<i64: 1, 20>}, {pipeline_mode = #tpu.pipeline_mode<synchronous>, transform_indices = @transform_14, window_bounds = array<i64: 20, 40>}, {pipeline_mode = #tpu.pipeline_mode<synchronous>, transform_indices = @transform_15, window_bounds = array<i64: 1, 40>}, {pipeline_mode = #tpu.pipeline_mode<synchronous>, transform_indices = @transform_16, window_bounds = array<i64: 40, 80>}, {pipeline_mode = #tpu.pipeline_mode<synchronous>, transform_indices = @transform_17, window_bounds = array<i64: 1, 80>}, {pipeline_mode = #tpu.pipeline_mode<synchronous>, transform_indices = @transform_18, window_bounds = array<i64: 80, 896>}, {pipeline_mode = #tpu.pipeline_mode<synchronous>, transform_indices = @transform_19, window_bounds = array<i64: 1, 896>}, {transform_indices = @transform_20, window_bounds = array<i64: 16, 896>}, {transform_indices = @transform_21, window_bounds = array<i64: 16, 10>}, {transform_indices = @transform_22, window_bounds = array<i64: 16, 10>}]} {
    %c0 = arith.constant 0 : index
    %c0_0 = arith.constant 0 : index
    %0 = vector.load %arg1[%c0, %c0_0] : memref<16x784xbf16, #tpu.memory_space<vmem>>, vector<16x784xbf16>
    %c0_1 = arith.constant 0 : index
    %c0_2 = arith.constant 0 : index
    %1 = vector.load %arg3[%c0_1, %c0_2] : memref<784x80xbf16, #tpu.memory_space<vmem>>, vector<784x80xbf16>
    %cst = arith.constant dense<0.000000e+00> : vector<16x80xf32>
    %2 = tpu.matmul %0, %1, %cst {dimension_numbers = #tpu.dot_dimension_numbers<[1], [0], [0], [1], [0, 0, 1, 1], [], []>} : vector<16x784xbf16>, vector<784x80xbf16>, vector<16x80xf32> -> vector<16x80xf32>
    %c0_3 = arith.constant 0 : index
    %c0_4 = arith.constant 0 : index
    %3 = vector.load %arg4[%c0_3, %c0_4] : memref<1x80xf32, #tpu.memory_space<vmem>>, vector<1x80xf32>
    %4 = vector.broadcast %3 : vector<1x80xf32> to vector<16x80xf32>
    %5 = arith.addf %2, %4 : vector<16x80xf32>
    %cst_5 = arith.constant 0.000000e+00 : f32
    %6 = vector.broadcast %cst_5 : f32 to vector<16x80xf32>
    %7 = arith.maximumf %5, %6 : vector<16x80xf32>
    %8 = arith.truncf %7 : vector<16x80xf32> to vector<16x80xbf16>
    %c0_6 = arith.constant 0 : index
    %c0_7 = arith.constant 0 : index
    %9 = vector.load %arg5[%c0_6, %c0_7] : memref<80x40xbf16, #tpu.memory_space<vmem>>, vector<80x40xbf16>
    %cst_8 = arith.constant dense<0.000000e+00> : vector<16x40xf32>
    %10 = tpu.matmul %8, %9, %cst_8 {dimension_numbers = #tpu.dot_dimension_numbers<[1], [0], [0], [1], [0, 0, 1, 1], [], []>} : vector<16x80xbf16>, vector<80x40xbf16>, vector<16x40xf32> -> vector<16x40xf32>
    %c0_9 = arith.constant 0 : index
    %c0_10 = arith.constant 0 : index
    %11 = vector.load %arg6[%c0_9, %c0_10] : memref<1x40xf32, #tpu.memory_space<vmem>>, vector<1x40xf32>
    %12 = vector.broadcast %11 : vector<1x40xf32> to vector<16x40xf32>
    %13 = arith.addf %10, %12 : vector<16x40xf32>
    %cst_11 = arith.constant 0.000000e+00 : f32
    %14 = vector.broadcast %cst_11 : f32 to vector<16x40xf32>
    %15 = arith.maximumf %13, %14 : vector<16x40xf32>
    %16 = arith.truncf %15 : vector<16x40xf32> to vector<16x40xbf16>
    %c0_12 = arith.constant 0 : index
    %c0_13 = arith.constant 0 : index
    %17 = vector.load %arg7[%c0_12, %c0_13] : memref<40x20xbf16, #tpu.memory_space<vmem>>, vector<40x20xbf16>
    %cst_14 = arith.constant dense<0.000000e+00> : vector<16x20xf32>
    %18 = tpu.matmul %16, %17, %cst_14 {dimension_numbers = #tpu.dot_dimension_numbers<[1], [0], [0], [1], [0, 0, 1, 1], [], []>} : vector<16x40xbf16>, vector<40x20xbf16>, vector<16x20xf32> -> vector<16x20xf32>
    %c0_15 = arith.constant 0 : index
    %c0_16 = arith.constant 0 : index
    %19 = vector.load %arg8[%c0_15, %c0_16] : memref<1x20xf32, #tpu.memory_space<vmem>>, vector<1x20xf32>
    %20 = vector.broadcast %19 : vector<1x20xf32> to vector<16x20xf32>
    %21 = arith.addf %18, %20 : vector<16x20xf32>
    %cst_17 = arith.constant 0.000000e+00 : f32
    %22 = vector.broadcast %cst_17 : f32 to vector<16x20xf32>
    %23 = arith.maximumf %21, %22 : vector<16x20xf32>
    %24 = arith.truncf %23 : vector<16x20xf32> to vector<16x20xbf16>
    %c0_18 = arith.constant 0 : index
    %c0_19 = arith.constant 0 : index
    %25 = vector.load %arg9[%c0_18, %c0_19] : memref<20x10xbf16, #tpu.memory_space<vmem>>, vector<20x10xbf16>
    %cst_20 = arith.constant dense<0.000000e+00> : vector<16x10xf32>
    %26 = tpu.matmul %24, %25, %cst_20 {dimension_numbers = #tpu.dot_dimension_numbers<[1], [0], [0], [1], [0, 0, 1, 1], [], []>} : vector<16x20xbf16>, vector<20x10xbf16>, vector<16x10xf32> -> vector<16x10xf32>
    %c0_21 = arith.constant 0 : index
    %c0_22 = arith.constant 0 : index
    %27 = vector.load %arg10[%c0_21, %c0_22] : memref<1x10xf32, #tpu.memory_space<vmem>>, vector<1x10xf32>
    %28 = vector.broadcast %27 : vector<1x10xf32> to vector<16x10xf32>
    %29 = arith.addf %26, %28 : vector<16x10xf32>
    %c0_23 = arith.constant 0 : index
    %c0_24 = arith.constant 0 : index
    %30 = vector.load %arg11[%c0_23, %c0_24] : memref<20x10xbf16, #tpu.memory_space<vmem>>, vector<20x10xbf16>
    %cst_25 = arith.constant dense<0.000000e+00> : vector<16x10xf32>
    %31 = tpu.matmul %24, %30, %cst_25 {dimension_numbers = #tpu.dot_dimension_numbers<[1], [0], [0], [1], [0, 0, 1, 1], [], []>} : vector<16x20xbf16>, vector<20x10xbf16>, vector<16x10xf32> -> vector<16x10xf32>
    %c0_26 = arith.constant 0 : index
    %c0_27 = arith.constant 0 : index
    %32 = vector.load %arg12[%c0_26, %c0_27] : memref<1x10xf32, #tpu.memory_space<vmem>>, vector<1x10xf32>
    %33 = vector.broadcast %32 : vector<1x10xf32> to vector<16x10xf32>
    %34 = arith.addf %31, %33 : vector<16x10xf32>
    %c0_28 = arith.constant 0 : index
    %c0_29 = arith.constant 0 : index
    %35 = vector.load %arg2[%c0_28, %c0_29] : memref<16x10xf32, #tpu.memory_space<vmem>>, vector<16x10xf32>
    %cst_30 = arith.constant 5.000000e-01 : f32
    %36 = vector.broadcast %cst_30 : f32 to vector<16x10xf32>
    %37 = arith.mulf %36, %34 : vector<16x10xf32>
    %38 = math.exp %37 : vector<16x10xf32>
    %39 = arith.mulf %35, %38 : vector<16x10xf32>
    %40 = arith.addf %29, %39 : vector<16x10xf32>
    %41 = arith.truncf %40 : vector<16x10xf32> to vector<16x10xbf16>
    %c0_31 = arith.constant 0 : index
    %c0_32 = arith.constant 0 : index
    %42 = vector.load %arg13[%c0_31, %c0_32] : memref<10x20xbf16, #tpu.memory_space<vmem>>, vector<10x20xbf16>
    %cst_33 = arith.constant dense<0.000000e+00> : vector<16x20xf32>
    %43 = tpu.matmul %41, %42, %cst_33 {dimension_numbers = #tpu.dot_dimension_numbers<[1], [0], [0], [1], [0, 0, 1, 1], [], []>} : vector<16x10xbf16>, vector<10x20xbf16>, vector<16x20xf32> -> vector<16x20xf32>
    %c0_34 = arith.constant 0 : index
    %c0_35 = arith.constant 0 : index
    %44 = vector.load %arg14[%c0_34, %c0_35] : memref<1x20xf32, #tpu.memory_space<vmem>>, vector<1x20xf32>
    %45 = vector.broadcast %44 : vector<1x20xf32> to vector<16x20xf32>
    %46 = arith.addf %43, %45 : vector<16x20xf32>
    %cst_36 = arith.constant 0.000000e+00 : f32
    %47 = vector.broadcast %cst_36 : f32 to vector<16x20xf32>
    %48 = arith.maximumf %46, %47 : vector<16x20xf32>
    %49 = arith.truncf %48 : vector<16x20xf32> to vector<16x20xbf16>
    %c0_37 = arith.constant 0 : index
    %c0_38 = arith.constant 0 : index
    %50 = vector.load %arg15[%c0_37, %c0_38] : memref<20x40xbf16, #tpu.memory_space<vmem>>, vector<20x40xbf16>
    %cst_39 = arith.constant dense<0.000000e+00> : vector<16x40xf32>
    %51 = tpu.matmul %49, %50, %cst_39 {dimension_numbers = #tpu.dot_dimension_numbers<[1], [0], [0], [1], [0, 0, 1, 1], [], []>} : vector<16x20xbf16>, vector<20x40xbf16>, vector<16x40xf32> -> vector<16x40xf32>
    %c0_40 = arith.constant 0 : index
    %c0_41 = arith.constant 0 : index
    %52 = vector.load %arg16[%c0_40, %c0_41] : memref<1x40xf32, #tpu.memory_space<vmem>>, vector<1x40xf32>
    %53 = vector.broadcast %52 : vector<1x40xf32> to vector<16x40xf32>
    %54 = arith.addf %51, %53 : vector<16x40xf32>
    %cst_42 = arith.constant 0.000000e+00 : f32
    %55 = vector.broadcast %cst_42 : f32 to vector<16x40xf32>
    %56 = arith.maximumf %54, %55 : vector<16x40xf32>
    %57 = arith.truncf %56 : vector<16x40xf32> to vector<16x40xbf16>
    %c0_43 = arith.constant 0 : index
    %c0_44 = arith.constant 0 : index
    %58 = vector.load %arg17[%c0_43, %c0_44] : memref<40x80xbf16, #tpu.memory_space<vmem>>, vector<40x80xbf16>
    %cst_45 = arith.constant dense<0.000000e+00> : vector<16x80xf32>
    %59 = tpu.matmul %57, %58, %cst_45 {dimension_numbers = #tpu.dot_dimension_numbers<[1], [0], [0], [1], [0, 0, 1, 1], [], []>} : vector<16x40xbf16>, vector<40x80xbf16>, vector<16x80xf32> -> vector<16x80xf32>
    %c0_46 = arith.constant 0 : index
    %c0_47 = arith.constant 0 : index
    %60 = vector.load %arg18[%c0_46, %c0_47] : memref<1x80xf32, #tpu.memory_space<vmem>>, vector<1x80xf32>
    %61 = vector.broadcast %60 : vector<1x80xf32> to vector<16x80xf32>
    %62 = arith.addf %59, %61 : vector<16x80xf32>
    %cst_48 = arith.constant 0.000000e+00 : f32
    %63 = vector.broadcast %cst_48 : f32 to vector<16x80xf32>
    %64 = arith.maximumf %62, %63 : vector<16x80xf32>
    %65 = arith.truncf %64 : vector<16x80xf32> to vector<16x80xbf16>
    %c0_49 = arith.constant 0 : index
    %c0_50 = arith.constant 0 : index
    %66 = vector.load %arg19[%c0_49, %c0_50] : memref<80x896xbf16, #tpu.memory_space<vmem>>, vector<80x896xbf16>
    %cst_51 = arith.constant dense<0.000000e+00> : vector<16x896xf32>
    %67 = tpu.matmul %65, %66, %cst_51 {dimension_numbers = #tpu.dot_dimension_numbers<[1], [0], [0], [1], [0, 0, 1, 1], [], []>} : vector<16x80xbf16>, vector<80x896xbf16>, vector<16x896xf32> -> vector<16x896xf32>
    %c0_52 = arith.constant 0 : index
    %c0_53 = arith.constant 0 : index
    %68 = vector.load %arg20[%c0_52, %c0_53] : memref<1x896xf32, #tpu.memory_space<vmem>>, vector<1x896xf32>
    %69 = vector.broadcast %68 : vector<1x896xf32> to vector<16x896xf32>
    %70 = arith.addf %67, %69 : vector<16x896xf32>
    %c0_54 = arith.constant 0 : index
    %c0_55 = arith.constant 0 : index
    %71 = vector.load %arg21[%c0_54, %c0_55] : memref<16x896xf32, #tpu.memory_space<vmem>>, vector<16x896xf32>
    tpu.vector_store %arg21[%c0_54, %c0_55], %70 {strides = array<i32>} : memref<16x896xf32, #tpu.memory_space<vmem>>, vector<16x896xf32>,
    %c0_56 = arith.constant 0 : index
    %c0_57 = arith.constant 0 : index
    %72 = vector.load %arg22[%c0_56, %c0_57] : memref<16x10xf32, #tpu.memory_space<vmem>>, vector<16x10xf32>
    tpu.vector_store %arg22[%c0_56, %c0_57], %29 {strides = array<i32>} : memref<16x10xf32, #tpu.memory_space<vmem>>, vector<16x10xf32>,
    %c0_58 = arith.constant 0 : index
    %c0_59 = arith.constant 0 : index
    %73 = vector.load %arg23[%c0_58, %c0_59] : memref<16x10xf32, #tpu.memory_space<vmem>>, vector<16x10xf32>
    tpu.vector_store %arg23[%c0_58, %c0_59], %34 {strides = array<i32>} : memref<16x10xf32, #tpu.memory_space<vmem>>, vector<16x10xf32>,
    return
  }
  func.func @transform_0(%arg0: i32) -> (i32, i32) {
    %c0_i32 = arith.constant 0 : i32
    %c0_i32_0 = arith.constant 0 : i32
    return %arg0, %c0_i32 : i32, i32
  }
  func.func @transform_1(%arg0: i32) -> (i32, i32) {
    %c0_i32 = arith.constant 0 : i32
    %c0_i32_0 = arith.constant 0 : i32
    return %arg0, %c0_i32 : i32, i32
  }
  func.func @transform_2(%arg0: i32) -> (i32, i32) {
    %c0_i32 = arith.constant 0 : i32
    %c0_i32_0 = arith.constant 0 : i32
    %c0_i32_1 = arith.constant 0 : i32
    return %c0_i32, %c0_i32_0 : i32, i32
  }
  func.func @transform_3(%arg0: i32) -> (i32, i32) {
    %c0_i32 = arith.constant 0 : i32
    %c0_i32_0 = arith.constant 0 : i32
    %c0_i32_1 = arith.constant 0 : i32
    return %c0_i32, %c0_i32_0 : i32, i32
  }
  func.func @transform_4(%arg0: i32) -> (i32, i32) {
    %c0_i32 = arith.constant 0 : i32
    %c0_i32_0 = arith.constant 0 : i32
    %c0_i32_1 = arith.constant 0 : i32
    return %c0_i32, %c0_i32_0 : i32, i32
  }
  func.func @transform_5(%arg0: i32) -> (i32, i32) {
    %c0_i32 = arith.constant 0 : i32
    %c0_i32_0 = arith.constant 0 : i32
    %c0_i32_1 = arith.constant 0 : i32
    return %c0_i32, %c0_i32_0 : i32, i32
  }
  func.func @transform_6(%arg0: i32) -> (i32, i32) {
    %c0_i32 = arith.constant 0 : i32
    %c0_i32_0 = arith.constant 0 : i32
    %c0_i32_1 = arith.constant 0 : i32
    return %c0_i32, %c0_i32_0 : i32, i32
  }
  func.func @transform_7(%arg0: i32) -> (i32, i32) {
    %c0_i32 = arith.constant 0 : i32
    %c0_i32_0 = arith.constant 0 : i32
    %c0_i32_1 = arith.constant 0 : i32
    return %c0_i32, %c0_i32_0 : i32, i32
  }
  func.func @transform_8(%arg0: i32) -> (i32, i32) {
    %c0_i32 = arith.constant 0 : i32
    %c0_i32_0 = arith.constant 0 : i32
    %c0_i32_1 = arith.constant 0 : i32
    return %c0_i32, %c0_i32_0 : i32, i32
  }
  func.func @transform_9(%arg0: i32) -> (i32, i32) {
    %c0_i32 = arith.constant 0 : i32
    %c0_i32_0 = arith.constant 0 : i32
    %c0_i32_1 = arith.constant 0 : i32
    return %c0_i32, %c0_i32_0 : i32, i32
  }
  func.func @transform_10(%arg0: i32) -> (i32, i32) {
    %c0_i32 = arith.constant 0 : i32
    %c0_i32_0 = arith.constant 0 : i32
    %c0_i32_1 = arith.constant 0 : i32
    return %c0_i32, %c0_i32_0 : i32, i32
  }
  func.func @transform_11(%arg0: i32) -> (i32, i32) {
    %c0_i32 = arith.constant 0 : i32
    %c0_i32_0 = arith.constant 0 : i32
    %c0_i32_1 = arith.constant 0 : i32
    return %c0_i32, %c0_i32_0 : i32, i32
  }
  func.func @transform_12(%arg0: i32) -> (i32, i32) {
    %c0_i32 = arith.constant 0 : i32
    %c0_i32_0 = arith.constant 0 : i32
    %c0_i32_1 = arith.constant 0 : i32
    return %c0_i32, %c0_i32_0 : i32, i32
  }
  func.func @transform_13(%arg0: i32) -> (i32, i32) {
    %c0_i32 = arith.constant 0 : i32
    %c0_i32_0 = arith.constant 0 : i32
    %c0_i32_1 = arith.constant 0 : i32
    return %c0_i32, %c0_i32_0 : i32, i32
  }
  func.func @transform_14(%arg0: i32) -> (i32, i32) {
    %c0_i32 = arith.constant 0 : i32
    %c0_i32_0 = arith.constant 0 : i32
    %c0_i32_1 = arith.constant 0 : i32
    return %c0_i32, %c0_i32_0 : i32, i32
  }
  func.func @transform_15(%arg0: i32) -> (i32, i32) {
    %c0_i32 = arith.constant 0 : i32
    %c0_i32_0 = arith.constant 0 : i32
    %c0_i32_1 = arith.constant 0 : i32
    return %c0_i32, %c0_i32_0 : i32, i32
  }
  func.func @transform_16(%arg0: i32) -> (i32, i32) {
    %c0_i32 = arith.constant 0 : i32
    %c0_i32_0 = arith.constant 0 : i32
    %c0_i32_1 = arith.constant 0 : i32
    return %c0_i32, %c0_i32_0 : i32, i32
  }
  func.func @transform_17(%arg0: i32) -> (i32, i32) {
    %c0_i32 = arith.constant 0 : i32
    %c0_i32_0 = arith.constant 0 : i32
    %c0_i32_1 = arith.constant 0 : i32
    return %c0_i32, %c0_i32_0 : i32, i32
  }
  func.func @transform_18(%arg0: i32) -> (i32, i32) {
    %c0_i32 = arith.constant 0 : i32
    %c0_i32_0 = arith.constant 0 : i32
    %c0_i32_1 = arith.constant 0 : i32
    return %c0_i32, %c0_i32_0 : i32, i32
  }
  func.func @transform_19(%arg0: i32) -> (i32, i32) {
    %c0_i32 = arith.constant 0 : i32
    %c0_i32_0 = arith.constant 0 : i32
    %c0_i32_1 = arith.constant 0 : i32
    return %c0_i32, %c0_i32_0 : i32, i32
  }
  func.func @transform_20(%arg0: i32) -> (i32, i32) {
    %c0_i32 = arith.constant 0 : i32
    %c0_i32_0 = arith.constant 0 : i32
    return %arg0, %c0_i32 : i32, i32
  }
  func.func @transform_21(%arg0: i32) -> (i32, i32) {
    %c0_i32 = arith.constant 0 : i32
    %c0_i32_0 = arith.constant 0 : i32
    return %arg0, %c0_i32 : i32, i32
  }
  func.func @transform_22(%arg0: i32) -> (i32, i32) {
    %c0_i32 = arith.constant 0 : i32
    %c0_i32_0 = arith.constant 0 : i32
    return %arg0, %c0_i32 : i32, i32
  }
}

</mosaic_0001>

<bundles_post_ra>
// kernel: tpu_custom_call.1
= control target key start
LH: loop header
LB: loop body
LE: loop exit
PB: predicated region body
PF: predicated region fallthrough
CT: control target
= control target key end

     0   :  { %s2815_s0 = inlined_call_operand.vmem [shape: bf16[16,784], index: 0, kind: input, shape index: {}]   ;;  %s2816_s1 = inlined_call_operand.vmem [shape: f32[16,10], index: 1, kind: input, shape index: {}]   ;;  %s2817_s2 = inlined_call_operand.vmem [shape: bf16[784,80], index: 2, kind: input, shape index: {}]   ;;  %s2818_s3 = inlined_call_operand.vmem [shape: f32[1,80], index: 3, kind: input, shape index: {}]   ;;  %s2819_s4 = inlined_call_operand.vmem [shape: bf16[80,40], index: 4, kind: input, shape index: {}]   ;;  %s2820_s5 = inlined_call_operand.vmem [shape: f32[1,40], index: 5, kind: input, shape index: {}]   ;;  %s2821_s6 = inlined_call_operand.vmem [shape: bf16[40,20], index: 6, kind: input, shape index: {}]   ;;  %s2822_s7 = inlined_call_operand.vmem [shape: f32[1,20], index: 7, kind: input, shape index: {}]   ;;  %s2823_s8 = inlined_call_operand.vmem [shape: bf16[20,10], index: 8, kind: input, shape index: {}]   ;;  %s2824_s9 = inlined_call_operand.vmem [shape: f32[1,10], index: 9, kind: input, shape index: {}]   ;;  %s2825_s10 = inlined_call_operand.vmem [shape: bf16[20,10], index: 10, kind: input, shape index: {}]   ;;  %s2826_s11 = inlined_call_operand.vmem [shape: f32[1,10], index: 11, kind: input, shape index: {}]   ;;  %s2827_s12 = inlined_call_operand.vmem [shape: bf16[10,20], index: 12, kind: input, shape index: {}]   ;;  %s2828_s13 = inlined_call_operand.vmem [shape: f32[1,20], index: 13, kind: input, shape index: {}]   ;;  %s2829_s14 = inlined_call_operand.vmem [shape: bf16[20,40], index: 14, kind: input, shape index: {}]   ;;  %s2830_s15 = inlined_call_operand.vmem [shape: f32[1,40], index: 15, kind: input, shape index: {}]   ;;  %s2831_s16 = inlined_call_operand.vmem [shape: bf16[40,80], index: 16, kind: input, shape index: {}]   ;;  %s2832_s17 = inlined_call_operand.vmem [shape: f32[1,80], index: 17, kind: input, shape index: {}]   ;;  %s2833_s18 = inlined_call_operand.vmem [shape: bf16[80,896], index: 18, kind: input, shape index: {}]   ;;  %s2834_s19 = inlined_call_operand.vmem [shape: f32[1,896], index: 19, kind: input, shape index: {}]   ;;  %s2835_s20 = inlined_call_operand.hbm [shape: f32[16,896], index: 20, kind: output, shape index: {0}]   ;;  %s2836_s21 = inlined_call_operand.hbm [shape: f32[16,10], index: 21, kind: output, shape index: {1}]   ;;  %s2837_s22 = inlined_call_operand.hbm [shape: f32[16,10], index: 22, kind: output, shape index: {2}]  }
   0x1   :  { %2843 = sst [smem:[#allocation9_spill]] %s2815_s0 }
   0x2   :  { %2844 = sst [smem:[#allocation10_spill]] %s2816_s1 }
   0x3   :  { %2845 = sst [smem:[#allocation11_spill]] %s2817_s2 }
   0x4   :  { %2846 = sst [smem:[#allocation12_spill]] %s2818_s3 }
   0x5   :  { %2847 = sst [smem:[#allocation13_spill]] %s2819_s4 }
   0x6   :  { %2848 = sst [smem:[#allocation14_spill]] %s2820_s5 }
   0x7   :  { %2849 = sst [smem:[#allocation15_spill]] %s2821_s6 }
   0x8   :  { %28 = vsyncpa [#allocation3], 0  ;;  %s2850_s29 = sld [smem:[#allocation11_spill]]  ;;  %s2851_s24 = sld [smem:[#allocation9_spill]]  ;;  %v2232_v38 = vmov 0.0   ;;  %vm2233_vm0 = vmmov 0  }
   0x9   :  { %vm513_vm1 = vcmask 130048  }
   0xe   :  { %v2031_v0 = vld [vmem:[%s2850_s29 + $0x40] sm:$0xff]   ;;  %v2035_v4 = vld [vmem:[%s2850_s29 + $0x48] sm:$0xff]   ;;  %v2039_v8 = vld [vmem:[%s2850_s29 + $0x50] sm:$0xff]  }
   0xf   :  { %v2032_v1 = vld [vmem:[%s2850_s29] sm:$0xff]   ;;  %1838 = vmatprep.subr.bf16.mxu0 %v2031_v0  ;;  %v2036_v5 = vld [vmem:[%s2850_s29 + $0x8] sm:$0xff]   ;;  %v2040_v9 = vld [vmem:[%s2850_s29 + $0x10] sm:$0xff]  }
  0x10   :  { %v2033_v2 = vld [vmem:[%s2850_s29 + $0xc0] sm:$0xff]   ;;  %1839 = vmatpush3.bf16.msra.mxu0 %v2032_v1  ;;  %v2037_v6 = vld [vmem:[%s2850_s29 + $0xc8] sm:$0xff]   ;;  %v2041_v10 = vld [vmem:[%s2850_s29 + $0xd0] sm:$0xff]  }
  0x11   :  { %v2034_v3 = vld [vmem:[%s2850_s29 + $0x80] sm:$0xff]   ;;  %1860 = vmatprep.subr.bf16.mxu1 %v2033_v2  ;;  %1840 = vmatprep.subr.bf16.mxu0 %v2035_v4  ;;  %v2038_v7 = vld [vmem:[%s2850_s29 + $0x88] sm:$0xff]   ;;  %v2042_v11 = vld [vmem:[%s2850_s29 + $0x90] sm:$0xff]  }
  0x12   :  { %1861 = vmatpush3.bf16.msra.mxu1 %v2034_v3  ;;  %v2043_v12 = vld [vmem:[%s2850_s29 + $0x58] sm:$0xff]   ;;  %v2047_v16 = vld [vmem:[%s2850_s29 + $0x60] sm:$0xff]   ;;  %v2051_v20 = vld [vmem:[%s2850_s29 + $0x68] sm:$0xff]  }
  0x13   :  { %1862 = vmatprep.subr.bf16.mxu1 %v2037_v6  ;;  %v2044_v13 = vld [vmem:[%s2850_s29 + $0x18] sm:$0xff]   ;;  %v2048_v17 = vld [vmem:[%s2850_s29 + $0x20] sm:$0xff]   ;;  %v2052_v21 = vld [vmem:[%s2850_s29 + $0x28] sm:$0xff]  }
  0x14   :  { %1841 = vmatpush3.bf16.msra.mxu0 %v2036_v5  ;;  %v2045_v14 = vld [vmem:[%s2850_s29 + $0xd8] sm:$0xff]   ;;  %v2049_v18 = vld [vmem:[%s2850_s29 + $0xe0] sm:$0xff]   ;;  %v2053_v22 = vld [vmem:[%s2850_s29 + $0xe8] sm:$0xff]  }
  0x15   :  { %1842 = vmatprep.subr.bf16.mxu0 %v2039_v8  ;;  %v2046_v15 = vld [vmem:[%s2850_s29 + $0x98] sm:$0xff]   ;;  %v2050_v19 = vld [vmem:[%s2850_s29 + $0xa0] sm:$0xff]   ;;  %v2054_v23 = vld [vmem:[%s2850_s29 + $0xa8] sm:$0xff]  }
  0x16   :  { %1863 = vmatpush3.bf16.msra.mxu1 %v2038_v7  ;;  %v2055_v24 = vld [vmem:[%s2850_s29 + $0x70] sm:$0xff]   ;;  %v2059_v28 = vld [vmem:[%s2850_s29 + $0x78] sm:$0xff]   ;;  %v2064_v32 = vld [vmem:[%s2851_s24 + $0x4] ss:$28 sps:$4 sm:$0xff]  }
  0x17   :  { %1864 = vmatprep.subr.bf16.mxu1 %v2041_v10  ;;  %v2056_v25 = vld [vmem:[%s2850_s29 + $0x30] sm:$0xff]   ;;  %v2060_v29 = vld [vmem:[%s2850_s29 + $0x38] sm:$0xff]   ;;  %549 = vmatprep.mubr.bf16.mxu0 %v2064_v32  ;;  %v2066_v34 = vld [vmem:[%s2850_s29 + $0x140] sm:$0xff]  }
  0x18   :  { %1843 = vmatpush3.bf16.msra.mxu0 %v2040_v9  ;;  %v2057_v26 = vld [vmem:[%s2850_s29 + $0xf0] sm:$0xff]   ;;  %v2061_v30 = vld [vmem:[%s2850_s29 + $0xf8] sm:$0xff]   ;;  %v2067_v35 = vld [vmem:[%s2851_s24 + $0x8] ss:$28 sps:$4 sm:$0xff]  }
  0x19   :  { %1844 = vmatprep.subr.bf16.mxu0 %v2043_v12  ;;  %v2058_v27 = vld [vmem:[%s2850_s29 + $0xb0] sm:$0xff]   ;;  %v2062_v31 = vld [vmem:[%s2851_s24] ss:$28 sps:$4 sm:$0xff]   ;;  %v2069_v36 = vld [vmem:[%s2851_s24 + $0xc] ss:$28 sps:$4 sm:$0xff]  }
  0x1a   :  { %1865 = vmatpush3.bf16.msra.mxu1 %v2042_v11  ;;  %v2065_v33 = vld [vmem:[%s2850_s29 + $0xb8] sm:$0xff]   ;;  %v2070_v37 = vld [vmem:[%s2850_s29 + $0x100] sm:$0xff]   ;;  %590 = vmatprep.mubr.bf16.mxu1 %v2069_v36  ;;  %v2071_v39 = vld [vmem:[%s2850_s29 + $0x148] sm:$0xff]  }
  0x1b   :  { %1866 = vmatprep.subr.bf16.mxu1 %v2045_v14  ;;  %v2072_v40 = vld [vmem:[%s2850_s29 + $0x108] sm:$0xff]   ;;  %v2073_v41 = vld [vmem:[%s2850_s29 + $0x150] sm:$0xff]   ;;  %v2075_v43 = vld [vmem:[%s2850_s29 + $0x158] sm:$0xff]  }
  0x1c   :  { %1845 = vmatpush3.bf16.msra.mxu0 %v2044_v13  ;;  %v2074_v42 = vld [vmem:[%s2850_s29 + $0x110] sm:$0xff]   ;;  %v2076_v44 = vld [vmem:[%s2850_s29 + $0x118] sm:$0xff]   ;;  %v2077_v45 = vld [vmem:[%s2850_s29 + $0x160] sm:$0xff]  }
  0x1d   :  { %1846 = vmatprep.subr.bf16.mxu0 %v2047_v16  ;;  %v2078_v46 = vld [vmem:[%s2850_s29 + $0x120] sm:$0xff]   ;;  %v2079_v47 = vld [vmem:[%s2850_s29 + $0x168] sm:$0xff]   ;;  %v2088_v50 = vld [vmem:[%s2851_s24 + $0x14] ss:$28 sps:$4 sm:$0xff]  }
  0x1e   :  { %1867 = vmatpush3.bf16.msra.mxu1 %v2046_v15  ;;  %v2085_v48 = vld [vmem:[%s2850_s29 + $0x180] sm:$0xff]   ;;  %v2080_v49 = vld [vmem:[%s2850_s29 + $0x128] sm:$0xff]   ;;  %v2081_v51 = vld [vmem:[%s2850_s29 + $0x170] sm:$0xff]  }
  0x1f   :  { %1868 = vmatprep.subr.bf16.mxu1 %v2049_v18  ;;  %v2089_v52 = vld [vmem:[%s2851_s24 + $0x18] ss:$28 sps:$4 sm:$0xff]   ;;  %v2086_v56 = vld [vmem:[%s2851_s24 + $0x10] ss:$28 sps:$4 sm:$0xff]  }
  0x20   :  { %1847 = vmatpush3.bf16.msra.mxu0 %v2048_v17  ;;  %v2082_v53 = vld [vmem:[%s2850_s29 + $0x130] sm:$0xff]   ;;  %v2083_v54 = vld [vmem:[%s2850_s29 + $0x178] sm:$0xff]  }
  0x21   :  { %1848 = vmatprep.subr.bf16.mxu0 %v2051_v20  ;;  %v2084_v55 = vld [vmem:[%s2850_s29 + $0x138] sm:$0xff]  }
  0x22   :  { %1869 = vmatpush3.bf16.msra.mxu1 %v2050_v19 }
  0x23   :  { %1870 = vmatprep.subr.bf16.mxu1 %v2053_v22 }
  0x24   :  { %1849 = vmatpush3.bf16.msra.mxu0 %v2052_v21 }
  0x25   :  { %1850 = vmatprep.subr.bf16.mxu0 %v2055_v24 }
  0x26   :  { %1871 = vmatpush3.bf16.msra.mxu1 %v2054_v23 }
  0x27   :  { %1872 = vmatprep.subr.bf16.mxu1 %v2057_v26 }
  0x28   :  { %1851 = vmatpush3.bf16.msra.mxu0 %v2056_v25 }
  0x29   :  { %1852 = vmatprep.subr.bf16.mxu0 %v2059_v28 }
  0x2a   :  { %1873 = vmatpush3.bf16.msra.mxu1 %v2058_v27 }
  0x2b   :  { %1874 = vmatprep.subr.bf16.mxu1 %v2061_v30 }
  0x2c   :  { %1853 = vmatpush3.bf16.msra.mxu0 %v2060_v29 }
  0x2d   :  { %1882 = vmatprep.subr.bf16.mxu0 %v2066_v34 }
  0x2e   :  { %1875 = vmatpush3.bf16.msra.mxu1 %v2065_v33 }
  0x2f   :  { %550 = vmatmul.mubr.bf16.vlgmr.msra.gmra.mrb[0].mxu0 %v2062_v31  ;;  %1937 = vmatprep.subr.bf16.mxu1 %v2232_v38 }
  0x30   :  { %1883 = vmatpush3.bf16.msra.mxu0 %v2070_v37  ;;  %631 = vmatprep.mubr.bf16.mxu0 %v2088_v50 }
  0x31   :  { %591 = vmatmul.mubr.bf16.vlgmr.msra.gmra.mrb[0].mxu1 %v2067_v35  ;;  %1884 = vmatprep.subr.bf16.mxu0 %v2071_v39 }
  0x32   :  { %1939 = vmatprep.mubr.msk.bf16.mxu1 %vm2233_vm0, %v2232_v38  ;;  %1938 = vmatpush3.bf16.msra.mxu1 %v2085_v48 }
  0x33   :  { %1943 = vmatprep.subr.bf16.mxu1 %v2232_v38 }
  0x34   :  { %1885 = vmatpush3.bf16.msra.mxu0 %v2072_v40 }
  0x35   :  { %1886 = vmatprep.subr.bf16.mxu0 %v2073_v41 }
  0x38   :  { %1887 = vmatpush3.bf16.msra.mxu0 %v2074_v42 }
  0x39   :  { %1888 = vmatprep.subr.bf16.mxu0 %v2075_v43  ;;  %1940 = vmatmul.mubr.msk.bf16.vlgmr.msra.gmra.mrb[4].mxu1 %vm513_vm1, %v2089_v52 }
  0x3a   :  { %1953 = vmatprep.mubr.msk.bf16.mxu1 %vm2233_vm0, %v2232_v38 }
  0x3c   :  { %1889 = vmatpush3.bf16.msra.mxu0 %v2076_v44 }
  0x3d   :  { %1890 = vmatprep.subr.bf16.mxu0 %v2077_v45 }
  0x40   :  { %1891 = vmatpush3.bf16.msra.mxu0 %v2078_v46 }
  0x41   :  { %1892 = vmatprep.subr.bf16.mxu0 %v2079_v47 }
  0x44   :  { %1893 = vmatpush3.bf16.msra.mxu0 %v2080_v49 }
  0x45   :  { %1894 = vmatprep.subr.bf16.mxu0 %v2081_v51 }
  0x48   :  { %1895 = vmatpush3.bf16.msra.mxu0 %v2082_v53 }
  0x49   :  { %1896 = vmatprep.subr.bf16.mxu0 %v2083_v54 }
  0x4c   :  { %1897 = vmatpush3.bf16.msra.mxu0 %v2084_v55 }
  0x4d   :  { %1967 = vmatprep.subr.bf16.mxu0 %v2232_v38 }
  0x4f   :  { %632 = vmatmul.mubr.bf16.vlgmr.msra.gmra.mrb[4].mxu0 %v2086_v56 }
  0x50   :  { %1971 = vmatprep.mubr.msk.bf16.mxu0 %vm2233_vm0, %v2232_v38 }
  0x51   :  { %29 = vsyncpa [#allocation5], 0  ;;  %s2852_s1 = sld [smem:[#allocation13_spill]]  ;;  %s2853_s30 = sld [smem:[#allocation12_spill]]  ;;  %vm731_vm2 = vcmask 654336   ;;  %vm810_vm3 = vcmask 1043456  }
  0x52   :  { %s2854_s23 = sld [smem:[#allocation15_spill]]  ;;  %s2855_s26 = sld [smem:[#allocation14_spill]]  ;;  %vm806_vm4 = vcmask 326656   ;;  %v2098_v47 = vld [vmem:[%s2823_s8] sm:$0xff]   ;;  %vm881_vm5 = vcmask 1041408   ;;  %vm877_vm6 = vcmask 162816  }
  0x53   :  { %1968 = vmatpush3.bf16.msra.mxu0 %v2098_v47  ;;  %v2099_v48 = vld [vmem:[%s2823_s8 + $0x8] ss:$0 sps:$4 sm:$0x33]   ;;  %v1774_v50 = vld [vmem:[%s2822_s7] ss:$0 sm:$0xff]  ;;  %vm1020_vm7 = vcmask 1044480  }
  0x54   :  { %1969 = vmatprep.subr.bf16.mxu0 %v2232_v38  ;;  %v883_v49 = vsel %vm881_vm5, %v2099_v48, 0  ;;  %vm1016_vm8 = vcmask 80896   ;;  %s2856_s25 = sld [smem:[#allocation10_spill]]  ;;  %v2110_v47 = vld [vmem:[%s2833_s18 + $0x4] ss:$28 sps:$4 sm:$0xff]  }
  0x55   :  { %v2113_v48 = vld [vmem:[%s2833_s18 + $0xc] ss:$28 sps:$4 sm:$0xff]  }
  0x57   :  { %v2090_v57 = vld [vmem:[%s2852_s1] sm:$0xff]   ;;  %v2091_v58 = vld [vmem:[%s2852_s1 + $0x8] sm:$0xff]   ;;  %v2092_v59 = vld [vmem:[%s2852_s1 + $0x10] sm:$0xff]   ;;  %1970 = vmatpush3.bf16.msra.mxu0 %v883_v49 }
  0x58   :  { %1944 = vmatpush3.bf16.msra.mxu1 %v2090_v57  ;;  %v2093_v60 = vld [vmem:[%s2852_s1 + $0x18] sm:$0xff]   ;;  %v2094_v61 = vld [vmem:[%s2852_s1 + $0x20] sm:$0xff]   ;;  %v2096_v33 = vld [vmem:[%s2854_s23 + $0x8] sm:$0xff]   ;;  %1975 = vmatprep.subr.bf16.mxu0 %v2232_v38  ;;  %s2235_s1 = smov [#allocation4]  }
  0x59   :  { %1945 = vmatprep.subr.bf16.mxu1 %v2232_v38  ;;  %v1709_v63 = vld [vmem:[%s2853_s30] ss:$0 sm:$0xff]  ;;  %v2097_v34 = vld [vmem:[%s2854_s23 + $0x10] ss:$0 sps:$4 sm:$0xff]   ;;  %v2116_v49 = vld [vmem:[%s2833_s18 + $0x3c] ss:$28 sps:$4 sm:$0xff]  }
  0x5a   :  { %v2095_v31 = vld [vmem:[%s2854_s23] sm:$0xff]   ;;  %v812_v35 = vsel %vm810_vm3, %v2097_v34, 0 }
  0x5b   :  { %v1767_v36 = vld [vmem:[%s2855_s26] ss:$0 sm:$0xff] }
  0x5c   :  { %1946 = vmatpush3.bf16.msra.mxu1 %v2091_v58 }
  0x5d   :  { %1947 = vmatprep.subr.bf16.mxu1 %v2232_v38 }
  0x60   :  { %1948 = vmatpush3.bf16.msra.mxu1 %v2092_v59  ;;  %v2100_v59 = vld [vmem:[%s2825_s10] sm:$0xff]  }
  0x61   :  { %1949 = vmatprep.subr.bf16.mxu1 %v2232_v38 }
  0x64   :  { %1950 = vmatpush3.bf16.msra.mxu1 %v2093_v60 }
  0x65   :  { %1951 = vmatprep.subr.bf16.mxu1 %v2232_v38 }
  0x68   :  { %1952 = vmatpush3.bf16.msra.mxu1 %v2094_v61  ;;  %v2101_v61 = vld [vmem:[%s2825_s10 + $0x8] ss:$0 sps:$4 sm:$0x33]  }
  0x69   :  { %1957 = vmatprep.subr.bf16.mxu1 %v2232_v38 }
 0x102   :  { %v1854_v62 = vpop.f32.mrb[0].mxu0 }
 0x103   :  { %v1855_v0 = vpop.f32.mrb[1].mxu0 }
 0x104   :  { %v1856_v1 = vadd.f32 %v1855_v0, %v1854_v62  ;;  %v1857_v2 = vpop.f32.mrb[2].mxu0  ;;  %v1876_v3 = vpop.f32.mrb[0].mxu1  ;;  %v946_v62 = vsel %vm881_vm5, %v2101_v61, 0 }
 0x105   :  { %v1858_v4 = vpop.f32.mrb[3].mxu0  ;;  %v1877_v7 = vpop.f32.mrb[1].mxu1 }
 0x106   :  { %v552_v5 = vadd.f32 %v1856_v1, %v1709_v63  ;;  %v1859_v6 = vadd.f32 %v1858_v4, %v1857_v2  ;;  %v1878_v8 = vadd.f32 %v1877_v7, %v1876_v3  ;;  %v1879_v9 = vpop.f32.mrb[2].mxu1  ;;  %v1779_v1 = vld [vmem:[%s2824_s9] ss:$0 sm:$0xff] }
 0x107   :  { %v1880_v11 = vpop.f32.mrb[3].mxu1 }
 0x108   :  { %v555_v10 = vadd.f32 %v1859_v6, %v1709_v63  ;;  %v593_v12 = vadd.f32 %v1878_v8, %v552_v5  ;;  %v1881_v13 = vadd.f32 %v1880_v11, %v1879_v9  ;;  %v2102_v63 = vld [vmem:[%s2827_s12] sm:$0x1f]  }
 0x109   :  { %v1022_v0 = vsel %vm1020_vm7, %v2102_v63, 0  ;;  %v1783_v8 = vld [vmem:[%s2826_s11] ss:$0 sm:$0xff] }
 0x10a   :  { %v596_v14 = vadd.f32 %v1881_v13, %v555_v10 }
 0x10c   :  { %v674_v15 = vpop.f32.mrb[4].mxu1 }
 0x10d   :  { %v1941_v16 = vpop.f32.mrb[5].mxu1 }
 0x10e   :  { %v677_v17 = vpop.f32.mrb[6].mxu1 }
 0x10f   :  { %v1942_v18 = vpop.f32.mrb[7].mxu1 }
 0x122   :  { %v1898_v19 = vpop.f32.mrb[4].mxu0 }
 0x123   :  { %v1899_v20 = vpop.f32.mrb[5].mxu0 }
 0x124   :  { %v1900_v21 = vadd.f32 %v1899_v20, %v1898_v19  ;;  %v1901_v22 = vpop.f32.mrb[6].mxu0  ;;  %v989_v19 = vld [vmem:[%s2856_s25] sm:$0xff] }
 0x125   :  { %v1902_v23 = vpop.f32.mrb[7].mxu0 }
 0x126   :  { %v634_v24 = vadd.f32 %v1900_v21, %v593_v12  ;;  %v1903_v25 = vadd.f32 %v1902_v23, %v1901_v22  ;;  %v990_v21 = vld [vmem:[%s2856_s25 + $0x8] sm:$0xff] }
 0x128   :  { %v675_v26 = vadd.f32 %v674_v15, %v634_v24  ;;  %v637_v27 = vadd.f32 %v1903_v25, %v596_v14 }
 0x12a   :  { %v678_v28 = vadd.f32 %v677_v17, %v637_v27  ;;  %v681_v29 = vmax.f32 %v675_v26, 0.0 }
 0x12c   :  { %v682_v30 = vmax.f32 %v678_v28, 0.0  ;;  %v2103_v28 = vld [vmem:[%s2829_s14] sm:$0xff]  }
 0x12e   :  { %v683_v32 = vpack.c.bf16 %v682_v30, %v681_v29  ;;  %v2104_v29 = vld [vmem:[%s2829_s14 + $0x8] ss:$0 sps:$4 sm:$0x33]  }
 0x12f   :  { %v1091_v30 = vsel %vm881_vm5, %v2104_v29, 0  ;;  %v2148_v29 = vld [vmem:[%s2833_s18 + $0x84] ss:$28 sps:$4 sm:$0xff]  }
 0x130   :  { %1954 = vmatmul.mubr.msk.bf16.vlgmr.msra.gmra.mrb[8].mxu1 %vm731_vm2, %v683_v32  ;;  %v1787_v32 = vld [vmem:[%s2828_s13] ss:$0 sm:$0xff]  ;;  %s1679_s13 = sshll.u32 %s2235_s1, 4  ;;  %s1680_s13 = int_to_ptr.vmem [resolvable:$true] %s1679_s13 }
 0x131   :  { %1958 = vmatpush3.bf16.msra.mxu1 %v2095_v31  ;;  %1963 = vmatprep.mubr.msk.bf16.mxu1 %vm2233_vm0, %v2232_v38  ;;  %v2105_v31 = vld [vmem:[%s2831_s16] sm:$0xff]   ;;  %s2162_s7 = scalar_lea.vmem %s1680_s13, 256  ;;  %p2167_p1 = scmp.lt.s32.totalorder %s1680_s13, %s1680_s13 }
 0x132   :  { %1959 = vmatprep.subr.bf16.mxu1 %v2232_v38  ;;  %p2163_p0 = scmp.ne.s32.totalorder %s1680_s13, %s2162_s7  ;;  %p2168_p2 = scmp.lt.s32.totalorder %s2162_s7, %s2162_s7 }
 0x134   :  { %p2169_p3 = por %p2168_p2, %p2167_p1 }
 0x135   :  { %1960 = vmatpush3.bf16.msra.mxu1 %v2096_v33 }
 0x136   :  { %1961 = vmatprep.subr.bf16.mxu1 %v2232_v38  ;;  %p2170_p4 = pnand %p2169_p3, %p2163_p0 }
 0x139   :  { %1962 = vmatpush3.bf16.msra.mxu1 %v812_v35 }
 0x13a   :  { %1983 = vmatprep.subr.bf16.mxu1 %v2232_v38 }
 0x203   :  { %v769_v37 = vpop.f32.mrb[8].mxu1 }
 0x204   :  { %v770_v39 = vadd.f32 %v1767_v36, %v769_v37  ;;  %v1955_v40 = vpop.f32.mrb[9].mxu1 }
 0x205   :  { %v772_v41 = vpop.f32.mrb[10].mxu1 }
 0x206   :  { %v773_v42 = vadd.f32 %v1767_v36, %v772_v41  ;;  %v1956_v43 = vpop.f32.mrb[11].mxu1  ;;  %v776_v44 = vmax.f32 %v770_v39, 0.0 }
 0x207   :  { %v2106_v43 = vld [vmem:[%s2831_s16 + $0x8] sm:$0xff]  }
 0x208   :  { %v777_v45 = vmax.f32 %v773_v42, 0.0 }
 0x20a   :  { %v778_v46 = vpack.c.bf16 %v777_v45, %v776_v44  ;;  %v2107_v44 = vld [vmem:[%s2831_s16 + $0x10] ss:$0 sps:$4 sm:$0xff]  }
 0x20b   :  { %v1168_v45 = vsel %vm810_vm3, %v2107_v44, 0 }
 0x20c   :  { %1964 = vmatmul.mubr.msk.bf16.vlgmr.msra.gmra.mrb[12].mxu1 %vm806_vm4, %v778_v46  ;;  %v2108_v46 = vld [vmem:[%s2833_s18] ss:$28 sps:$4 sm:$0xff]  }
 0x20d   :  { %1985 = vmatprep.mubr.msk.bf16.mxu1 %vm2233_vm0, %v2232_v38  ;;  %1984 = vmatpush3.bf16.msra.mxu1 %v1022_v0  ;;  %v2119_v0 = vld [vmem:[%s2833_s18 + $0x44] ss:$28 sps:$4 sm:$0xff]  }
 0x20e   :  { %1997 = vmatprep.subr.bf16.mxu1 %v2232_v38 }
 0x2df   :  { %v848_v51 = vpop.f32.mrb[12].mxu1 }
 0x2e0   :  { %v849_v52 = vadd.f32 %v1774_v50, %v848_v51  ;;  %v1965_v53 = vpop.f32.mrb[13].mxu1  ;;  %v2122_v51 = vld [vmem:[%s2833_s18 + $0x74] ss:$28 sps:$4 sm:$0xff]  }
 0x2e1   :  { %v851_v54 = vpop.f32.mrb[14].mxu1  ;;  %v1790_v53 = vld [vmem:[%s2830_s15] ss:$0 sm:$0xff] }
 0x2e2   :  { %v852_v55 = vadd.f32 %v1774_v50, %v851_v54  ;;  %v1966_v56 = vpop.f32.mrb[15].mxu1  ;;  %v855_v57 = vmax.f32 %v849_v52, 0.0  ;;  %v2114_v50 = vld [vmem:[%s2833_s18 + $0x38] ss:$28 sps:$4 sm:$0xff]   ;;  %v2120_v52 = vld [vmem:[%s2833_s18 + $0x70] ss:$28 sps:$4 sm:$0xff]  }
 0x2e4   :  { %v856_v58 = vmax.f32 %v852_v55, 0.0 }
 0x2e6   :  { %v857_v60 = vpack.c.bf16 %v856_v58, %v855_v57 }
 0x2e8   :  { %1972 = vmatmul.mubr.msk.bf16.vlgmr.msra.gmra.mrb[8].mxu0 %vm877_vm6, %v857_v60 }
 0x2e9   :  { %1976 = vmatpush3.bf16.msra.mxu0 %v2100_v59  ;;  %1979 = vmatprep.mubr.msk.bf16.mxu0 %vm2233_vm0, %v2232_v38 }
 0x2ea   :  { %1977 = vmatprep.subr.bf16.mxu0 %v2232_v38 }
 0x2ed   :  { %1978 = vmatpush3.bf16.msra.mxu0 %v946_v62  ;;  %v2111_v62 = vld [vmem:[%s2833_s18 + $0x8] ss:$28 sps:$4 sm:$0xff]  }
 0x2ee   :  { %1989 = vmatprep.subr.bf16.mxu0 %v2232_v38 }
 0x2f0   :  { %1980 = vmatmul.mubr.msk.bf16.vlgmr.msra.gmra.mrb[12].mxu0 %vm877_vm6, %v857_v60 }
 0x2f1   :  { %1993 = vmatprep.mubr.msk.bf16.mxu0 %vm2233_vm0, %v2232_v38  ;;  %1990 = vmatpush3.bf16.msra.mxu0 %v2103_v28  ;;  %v2145_v28 = vld [vmem:[%s2833_s18 + $0x50] ss:$28 sps:$4 sm:$0xff]  }
 0x2f2   :  { %1991 = vmatprep.subr.bf16.mxu0 %v2232_v38 }
 0x2f5   :  { %1992 = vmatpush3.bf16.msra.mxu0 %v1091_v30  ;;  %v2146_v30 = vld [vmem:[%s2833_s18 + $0x80] ss:$28 sps:$4 sm:$0xff]  }
 0x2f6   :  { %1474 = vmatprep.subr.bf16.mxu0 %v2110_v47 }
 0x3bb   :  { %v919_v2 = vpop.f32.mrb[8].mxu0 }
 0x3bc   :  { %v920_v3 = vadd.f32 %v1779_v1, %v919_v2  ;;  %v1973_v4 = vpop.f32.mrb[9].mxu0  ;;  %v2125_v2 = vld [vmem:[%s2833_s18 + $0x7c] ss:$28 sps:$4 sm:$0xff]  }
 0x3bd   :  { %v922_v5 = vpop.f32.mrb[10].mxu0  ;;  %v2128_v4 = vld [vmem:[%s2833_s18 + $0xac] ss:$28 sps:$4 sm:$0xff]  }
 0x3be   :  { %1658 = vst.msk [vmem:[#allocation4] sm:$0xff] %vm1016_vm8, %v920_v3  ;;  %v923_v6 = vadd.f32 %v1779_v1, %v922_v5  ;;  %v1974_v7 = vpop.f32.mrb[11].mxu0  ;;  %v2117_v1 = vld [vmem:[%s2833_s18 + $0x40] ss:$28 sps:$4 sm:$0xff]   ;;  %v2131_v5 = vld [vmem:[%s2833_s18 + $0xb4] ss:$28 sps:$4 sm:$0xff]  }
 0x3bf   :  { %v2129_v7 = vld [vmem:[%s2833_s18 + $0xb0] ss:$28 sps:$4 sm:$0xff]  }
 0x3c0   :  { %1659 = vst.msk [vmem:[#allocation4 + $0x8] sm:$0xff] %vm1016_vm8, %v923_v6 }
 0x3c3   :  { %v982_v9 = vpop.f32.mrb[12].mxu0 }
 0x3c4   :  { %v983_v10 = vadd.f32 %v1783_v8, %v982_v9  ;;  %v1981_v11 = vpop.f32.mrb[13].mxu0  ;;  %v2137_v9 = vld [vmem:[%s2833_s18 + $0xec] ss:$28 sps:$4 sm:$0xff]  }
 0x3c5   :  { %v985_v12 = vpop.f32.mrb[14].mxu0  ;;  %v2135_v11 = vld [vmem:[%s2833_s18 + $0xe8] ss:$28 sps:$4 sm:$0xff]  }
 0x3c6   :  { %v991_v13 = vmul.f32 0.5, %v983_v10  ;;  %1660 = vst.msk [vmem:[#allocation6] sm:$0xff] %vm1016_vm8, %v983_v10  ;;  %v986_v14 = vadd.f32 %v1783_v8, %v985_v12  ;;  %v1982_v15 = vpop.f32.mrb[15].mxu0  ;;  %v2134_v8 = vld [vmem:[%s2833_s18 + $0xe4] ss:$28 sps:$4 sm:$0xff]  }
 0x3c7   :  { %v2132_v10 = vld [vmem:[%s2833_s18 + $0xe0] ss:$28 sps:$4 sm:$0xff]   ;;  %v2140_v12 = vld [vmem:[%s2833_s18 + $0x14] ss:$28 sps:$4 sm:$0xff]  }
 0x3c8   :  { %v993_v16 = vmul.f32 1.442695, %v991_v13  ;;  %v992_v17 = vmul.f32 0.5, %v986_v14  ;;  %1661 = vst.msk [vmem:[#allocation6 + $0x8] sm:$0xff] %vm1016_vm8, %v986_v14  ;;  %v2234_v13 = vmov 0  }
 0x3c9   :  { %v1794_v14 = vld [vmem:[%s2832_s17] ss:$0 sm:$0xff] }
 0x3ca   :  { %2158 = vpow2.f32 %v993_v16  ;;  %v995_v18 = vmul.f32 1.442695, %v992_v17 }
 0x3cc   :  { %2160 = vpow2.f32 %v995_v18 }
 0x3d4   :  { %v2159_v20 = vpop.eup %2158 }
 0x3d5   :  { %v997_v22 = vmul.f32 %v2159_v20, %v989_v19 }
 0x3d6   :  { %v2161_v23 = vpop.eup %2160 }
 0x3d7   :  { %v998_v24 = vmul.f32 %v2161_v23, %v990_v21  ;;  %v999_v25 = vadd.f32 %v997_v22, %v920_v3  ;;  %v2123_v3 = vld [vmem:[%s2833_s18 + $0x78] ss:$28 sps:$4 sm:$0xff]   ;;  %v2138_v23 = vld [vmem:[%s2833_s18 + $0x10] ss:$28 sps:$4 sm:$0xff]  }
 0x3d9   :  { %v1000_v26 = vadd.f32 %v998_v24, %v923_v6  ;;  %v2126_v6 = vld [vmem:[%s2833_s18 + $0xa8] ss:$28 sps:$4 sm:$0xff]   ;;  %v2141_v24 = vld [vmem:[%s2833_s18 + $0x18] ss:$28 sps:$4 sm:$0xff]  }
 0x3db   :  { %v1001_v27 = vpack.c.bf16 %v1000_v26, %v999_v25  ;;  %v2144_v26 = vld [vmem:[%s2833_s18 + $0x4c] ss:$28 sps:$4 sm:$0xff]  }
 0x3dd   :  { %1986 = vmatmul.mubr.msk.bf16.vlgmr.msra.gmra.mrb[16].mxu1 %vm1016_vm8, %v1001_v27  ;;  %v2142_v27 = vld [vmem:[%s2833_s18 + $0x48] ss:$28 sps:$4 sm:$0xff]  }
 0x3de   :  { %2003 = vmatprep.mubr.msk.bf16.mxu1 %vm2233_vm0, %v2232_v38  ;;  %1998 = vmatpush3.bf16.msra.mxu1 %v2105_v31  ;;  %v2149_v31 = vld [vmem:[%s2833_s18 + $0x88] ss:$28 sps:$4 sm:$0xff]  }
 0x3df   :  { %1999 = vmatprep.subr.bf16.mxu1 %v2232_v38 }
 0x3e2   :  { %2000 = vmatpush3.bf16.msra.mxu1 %v2106_v43 }
 0x3e3   :  { %2001 = vmatprep.subr.bf16.mxu1 %v2232_v38 }
 0x3e6   :  { %2002 = vmatpush3.bf16.msra.mxu1 %v1168_v45 }
 0x3e7   :  { %1517 = vmatprep.subr.bf16.mxu1 %v2113_v48 }
 0x4b0   :  { %v1058_v33 = vpop.f32.mrb[16].mxu1 }
 0x4b1   :  { %v1059_v34 = vadd.f32 %v1787_v32, %v1058_v33  ;;  %v1987_v35 = vpop.f32.mrb[17].mxu1  ;;  %v2150_v33 = vld [vmem:[%s2833_s18 + $0xb8] ss:$28 sps:$4 sm:$0xff]  }
 0x4b2   :  { %v1061_v36 = vpop.f32.mrb[18].mxu1  ;;  %v2156_v35 = vld [vmem:[%s2833_s18 + $0xf4] ss:$28 sps:$4 sm:$0xff]  }
 0x4b3   :  { %v1062_v37 = vadd.f32 %v1787_v32, %v1061_v36  ;;  %v1988_v39 = vpop.f32.mrb[19].mxu1  ;;  %v1065_v40 = vmax.f32 %v1059_v34, 0.0  ;;  %v2152_v32 = vld [vmem:[%s2833_s18 + $0xbc] ss:$28 sps:$4 sm:$0xff]   ;;  %v2154_v36 = vld [vmem:[%s2833_s18 + $0xf0] ss:$28 sps:$4 sm:$0xff]  }
 0x4b4   :  { %v2153_v34 = vld [vmem:[%s2833_s18 + $0xc0] ss:$28 sps:$4 sm:$0xff]  }
 0x4b5   :  { %v1066_v41 = vmax.f32 %v1062_v37, 0.0  ;;  %v2157_v37 = vld [vmem:[%s2833_s18 + $0xf8] ss:$28 sps:$4 sm:$0xff]  }
 0x4b7   :  { %v1067_v42 = vpack.c.bf16 %v1066_v41, %v1065_v40 }
 0x4b9   :  { %1994 = vmatmul.mubr.msk.bf16.vlgmr.msra.gmra.mrb[16].mxu0 %vm877_vm6, %v1067_v42 }
 0x4ba   :  { %1475 = vmatpush1.bf16.msra.mxu0 %v2108_v46  ;;  %1506 = vmatprep.mubr.bf16.mxu0 %v2234_v13 }
 0x4bb   :  { %1476 = vmatprep.subr.bf16.mxu0 %v2116_v49 }
 0x4be   :  { %1477 = vmatpush1.bf16.msra.mxu0 %v2114_v50 }
 0x4bf   :  { %1478 = vmatprep.subr.bf16.mxu0 %v2122_v51 }
 0x4c2   :  { %1479 = vmatpush1.bf16.msra.mxu0 %v2120_v52 }
 0x4c3   :  { %1480 = vmatprep.subr.bf16.mxu0 %v2128_v4 }
 0x4c6   :  { %1481 = vmatpush1.bf16.msra.mxu0 %v2126_v6 }
 0x4c7   :  { %1482 = vmatprep.subr.bf16.mxu0 %v2134_v8 }
 0x4ca   :  { %1483 = vmatpush1.bf16.msra.mxu0 %v2132_v10 }
 0x4cb   :  { %1560 = vmatprep.subr.bf16.mxu0 %v2140_v12 }
 0x58c   :  { %v1127_v54 = vpop.f32.mrb[16].mxu0 }
 0x58d   :  { %v1128_v55 = vadd.f32 %v1790_v53, %v1127_v54  ;;  %v1995_v56 = vpop.f32.mrb[17].mxu0 }
 0x58e   :  { %v1130_v57 = vpop.f32.mrb[18].mxu0 }
 0x58f   :  { %v1131_v58 = vadd.f32 %v1790_v53, %v1130_v57  ;;  %v1996_v59 = vpop.f32.mrb[19].mxu0  ;;  %v1134_v60 = vmax.f32 %v1128_v55, 0.0 }
 0x591   :  { %v1135_v61 = vmax.f32 %v1131_v58, 0.0 }
 0x593   :  { %v1136_v63 = vpack.c.bf16 %v1135_v61, %v1134_v60 }
 0x595   :  { %2004 = vmatmul.mubr.msk.bf16.vlgmr.msra.gmra.mrb[20].mxu1 %vm806_vm4, %v1136_v63 }
 0x596   :  { %1518 = vmatpush1.bf16.msra.mxu1 %v2111_v62  ;;  %1549 = vmatprep.mubr.bf16.mxu1 %v2234_v13 }
 0x597   :  { %1519 = vmatprep.subr.bf16.mxu1 %v2119_v0 }
 0x59a   :  { %1520 = vmatpush1.bf16.msra.mxu1 %v2117_v1 }
 0x59b   :  { %1521 = vmatprep.subr.bf16.mxu1 %v2125_v2 }
 0x59e   :  { %1522 = vmatpush1.bf16.msra.mxu1 %v2123_v3 }
 0x59f   :  { %1523 = vmatprep.subr.bf16.mxu1 %v2131_v5 }
 0x5a2   :  { %1524 = vmatpush1.bf16.msra.mxu1 %v2129_v7 }
 0x5a3   :  { %1525 = vmatprep.subr.bf16.mxu1 %v2137_v9 }
 0x5a6   :  { %1526 = vmatpush1.bf16.msra.mxu1 %v2135_v11 }
 0x5a7   :  { %2007 = vmatprep.subr.bf16.mxu1 %v2232_v38 }
 0x668   :  { %v1204_v15 = vpop.f32.mrb[20].mxu1 }
 0x669   :  { %v1205_v16 = vadd.f32 %v1794_v14, %v1204_v15  ;;  %v2005_v17 = vpop.f32.mrb[21].mxu1 }
 0x66a   :  { %v1207_v18 = vpop.f32.mrb[22].mxu1 }
 0x66b   :  { %v1208_v19 = vadd.f32 %v1794_v14, %v1207_v18  ;;  %v2006_v20 = vpop.f32.mrb[23].mxu1  ;;  %v1211_v21 = vmax.f32 %v1205_v16, 0.0 }
 0x66d   :  { %v1212_v22 = vmax.f32 %v1208_v19, 0.0 }
 0x66f   :  { %v1213_v25 = vpack.c.bf16 %v1212_v22, %v1211_v21 }
 0x671   :  { %1834 = vmatmul.mubr.msk.bf16.vlgmr.msra.gmra.mrb[20].mxu0 %vm731_vm2, %v1213_v25  ;;  %1835 = vmatmul.mubr.msk.bf16.vlgmr.msra.gmra.mrb[24].mxu1 %vm731_vm2, %v1213_v25 }
 0x672   :  { %1561 = vmatpush1.bf16.msra.mxu0 %v2138_v23  ;;  %2008 = vmatpush3.bf16.msra.mxu1 %v2141_v24 }
 0x673   :  { %1562 = vmatprep.subr.bf16.mxu0 %v2144_v26  ;;  %2009 = vmatprep.subr.bf16.mxu1 %v2232_v38 }
 0x674   :  { %1592 = vmatprep.mubr.bf16.mxu0 %v2234_v13  ;;  %2017 = vmatprep.mubr.msk.bf16.mxu1 %vm2233_vm0, %v2232_v38 }
 0x676   :  { %1563 = vmatpush1.bf16.msra.mxu0 %v2142_v27  ;;  %2010 = vmatpush3.bf16.msra.mxu1 %v2145_v28 }
 0x677   :  { %1564 = vmatprep.subr.bf16.mxu0 %v2148_v29  ;;  %2011 = vmatprep.subr.bf16.mxu1 %v2232_v38 }
 0x67a   :  { %1565 = vmatpush1.bf16.msra.mxu0 %v2146_v30  ;;  %2012 = vmatpush3.bf16.msra.mxu1 %v2149_v31 }
 0x67b   :  { %1566 = vmatprep.subr.bf16.mxu0 %v2152_v32  ;;  %2013 = vmatprep.subr.bf16.mxu1 %v2232_v38 }
 0x67e   :  { %1567 = vmatpush1.bf16.msra.mxu0 %v2150_v33  ;;  %2014 = vmatpush3.bf16.msra.mxu1 %v2153_v34 }
 0x67f   :  { %1568 = vmatprep.subr.bf16.mxu0 %v2156_v35  ;;  %2015 = vmatprep.subr.bf16.mxu1 %v2232_v38 }
 0x682   :  { %1569 = vmatpush1.bf16.msra.mxu0 %v2154_v36  ;;  %2016 = vmatpush3.bf16.msra.mxu1 %v2157_v37 }
 0x685   :  { %1836 = vmatmul.mubr.msk.bf16.vlgmr.msra.gmra.mrb[24].mxu0 %vm731_vm2, %v1213_v25  ;;  %2018 = vmatmul.mubr.msk.bf16.vlgmr.msra.gmra.mrb[28].mxu1 %vm731_vm2, %v1213_v25 }
 0x686   :  { %2173 = shalt.err (!%p2170_p4)
}
 0x687   :  { %s2174_s17 = scalar_lea.hbm %s2836_s21, 256 }
 0x688   :  { %p2175_p5 = scmp.ne.s32.totalorder %s2836_s21, %s2174_s17  ;;  %p2178_p6 = scmp.lt.u32.totalorder %s2174_s17, %s2836_s21 }
 0x68a   :  { %p2180_p7 = pnand %p2178_p6, %p2175_p5 }
 0x68c   :  { %2183 = shalt.err (!%p2180_p7)
}
 0x68d   :  { %s2236_s9 = smov 128   ;;  %s2237_s6 = smov 8  }
 0x68e   :  { %1685 = dma.vmem_to_hbm [thread:$0]  %s1680_s13, 256, %s2836_s21, [#allocation5], %s2236_s9, %s2236_s9, %s2237_s6  }
 0x68f   :  { %s2238_s11 = smov [#allocation6]  }
 0x690   :  { %s1691_s26 = sshll.u32 %s2238_s11, 4  ;;  %s1692_s26 = int_to_ptr.vmem [resolvable:$true] %s1691_s26 }
 0x691   :  { %s2184_s2 = scalar_lea.vmem %s1692_s26, 256  ;;  %p2189_p9 = scmp.lt.s32.totalorder %s1692_s26, %s1692_s26 }
 0x692   :  { %p2185_p8 = scmp.ne.s32.totalorder %s1692_s26, %s2184_s2  ;;  %p2190_p10 = scmp.lt.s32.totalorder %s2184_s2, %s2184_s2 }
 0x694   :  { %p2191_p11 = por %p2190_p10, %p2189_p9 }
 0x696   :  { %p2192_p12 = pnand %p2191_p11, %p2185_p8 }
 0x698   :  { %2195 = shalt.err (!%p2192_p12)
}
 0x699   :  { %s2196_s28 = scalar_lea.hbm %s2837_s22, 256 }
 0x69a   :  { %p2197_p13 = scmp.ne.s32.totalorder %s2837_s22, %s2196_s28  ;;  %p2200_p0 = scmp.lt.u32.totalorder %s2196_s28, %s2837_s22 }
 0x69c   :  { %p2202_p1 = pnand %p2200_p0, %p2197_p13 }
 0x69e   :  { %2205 = shalt.err (!%p2202_p1)
}
 0x69f   :  { %1697 = dma.vmem_to_hbm [thread:$0]  %s1692_s26, 256, %s2837_s22, [#allocation5], %s2236_s9, %s2236_s9, %s2237_s6   ;;  %v1256_v38 = vlaneseq }
 0x6a0   :  { %v1254_v42 = vld [vmem:[%s2834_s19] sm:$0xff]  ;;  %s2239_s19 = smov [#allocation2]  }
 0x6a1   :  { %v1257_v39 = vshrl.u32 %v1256_v38, 7  ;;  %s1667_s22 = sshll.u32 %s2239_s19, 4  ;;  %s1668_s22 = int_to_ptr.vmem [resolvable:$true] %s1667_s22 }
 0x6a2   :  { %s2206_s1 = scalar_lea.vmem %s1668_s22, 1792  ;;  %p2211_p3 = scmp.lt.s32.totalorder %s1668_s22, %s1668_s22 }
 0x6a3   :  { %v1258_v40 = vsub.s32 0, %v1257_v39  ;;  %v1266_v41 = vsub.s32 2, %v1257_v39  ;;  %v1262_v43 = vsub.s32 1, %v1257_v39  ;;  %v1270_v44 = vsub.s32 3, %v1257_v39  ;;  %p2207_p2 = scmp.ne.s32.totalorder %s1668_s22, %s2206_s1  ;;  %p2212_p4 = scmp.lt.s32.totalorder %s2206_s1, %s2206_s1 }
 0x6a4   :  { %v1274_v1 = vsub.s32 4, %v1257_v39  ;;  %v1282_v2 = vsub.s32 6, %v1257_v39  ;;  %v1278_v3 = vsub.s32 5, %v1257_v39 }
 0x6a5   :  { %v1259_v45 = vrot.slane %v1254_v42, %v1258_v40  ;;  %v1267_v46 = vrot.slane %v1254_v42, %v1266_v41  ;;  %v1263_v47 = vrot.slane %v1254_v42, %v1262_v43  ;;  %v1271_v48 = vrot.slane %v1254_v42, %v1270_v44  ;;  %p2213_p5 = por %p2212_p4, %p2211_p3 }
 0x6a6   :  { %v1275_v4 = vrot.slane %v1254_v42, %v1274_v1  ;;  %v1283_v5 = vrot.slane %v1254_v42, %v1282_v2  ;;  %v1279_v6 = vrot.slane %v1254_v42, %v1278_v3 }
 0x6a7   :  { %p2214_p6 = pnand %p2213_p5, %p2207_p2 }
 0x744   :  { %v1508_v49 = vpop.f32.mrb[20].mxu0  ;;  %v1551_v50 = vpop.f32.mrb[24].mxu1 }
 0x745   :  { %v1509_v51 = vadd.f32 %v1508_v49, %v1259_v45  ;;  %v1552_v52 = vadd.f32 %v1551_v50, %v1267_v46  ;;  %v1510_v53 = vpop.f32.mrb[21].mxu0  ;;  %v1553_v54 = vpop.f32.mrb[25].mxu1 }
 0x746   :  { %v1511_v55 = vadd.f32 %v1510_v53, %v1263_v47  ;;  %v1554_v56 = vadd.f32 %v1553_v54, %v1271_v48  ;;  %v1512_v57 = vpop.f32.mrb[22].mxu0  ;;  %v1555_v58 = vpop.f32.mrb[26].mxu1 }
 0x747   :  { %1644 = vst [vmem:[#allocation2] sm:$0xff] %v1509_v51  ;;  %1646 = vst [vmem:[#allocation2 + $0x10] sm:$0xff] %v1552_v52  ;;  %v1513_v59 = vadd.f32 %v1512_v57, %v1259_v45  ;;  %v1556_v60 = vadd.f32 %v1555_v58, %v1267_v46  ;;  %v1514_v61 = vpop.f32.mrb[23].mxu0  ;;  %v1557_v62 = vpop.f32.mrb[27].mxu1 }
 0x748   :  { %1645 = vst [vmem:[#allocation2 + $0x8] sm:$0xff] %v1511_v55  ;;  %1647 = vst [vmem:[#allocation2 + $0x18] sm:$0xff] %v1554_v56  ;;  %v1515_v63 = vadd.f32 %v1514_v61, %v1263_v47  ;;  %v1558_v0 = vadd.f32 %v1557_v62, %v1271_v48 }
 0x749   :  { %1651 = vst [vmem:[#allocation2 + $0x38] sm:$0xff] %v1513_v59  ;;  %1653 = vst [vmem:[#allocation2 + $0x48] sm:$0xff] %v1556_v60 }
 0x74a   :  { %1652 = vst [vmem:[#allocation2 + $0x40] sm:$0xff] %v1515_v63  ;;  %1654 = vst [vmem:[#allocation2 + $0x50] sm:$0xff] %v1558_v0 }
 0x758   :  { %v1594_v7 = vpop.f32.mrb[24].mxu0  ;;  %v1637_v8 = vpop.f32.mrb[28].mxu1 }
 0x759   :  { %v1595_v9 = vadd.f32 %v1594_v7, %v1275_v4  ;;  %v1638_v10 = vadd.f32 %v1637_v8, %v1283_v5  ;;  %v1596_v11 = vpop.f32.mrb[25].mxu0  ;;  %v2019_v12 = vpop.f32.mrb[29].mxu1 }
 0x75a   :  { %v1597_v13 = vadd.f32 %v1596_v11, %v1279_v6  ;;  %v1598_v14 = vpop.f32.mrb[26].mxu0  ;;  %v1640_v15 = vpop.f32.mrb[30].mxu1 }
 0x75b   :  { %1648 = vst [vmem:[#allocation2 + $0x20] sm:$0xff] %v1595_v9  ;;  %1650 = vst [vmem:[#allocation2 + $0x30] sm:$0xff] %v1638_v10  ;;  %v1599_v16 = vadd.f32 %v1598_v14, %v1275_v4  ;;  %v1641_v17 = vadd.f32 %v1640_v15, %v1283_v5  ;;  %v1600_v18 = vpop.f32.mrb[27].mxu0  ;;  %v2020_v19 = vpop.f32.mrb[31].mxu1 }
 0x75c   :  { %1649 = vst [vmem:[#allocation2 + $0x28] sm:$0xff] %v1597_v13  ;;  %v1601_v20 = vadd.f32 %v1600_v18, %v1279_v6 }
 0x75d   :  { %1655 = vst [vmem:[#allocation2 + $0x58] sm:$0xff] %v1599_v16  ;;  %1657 = vst [vmem:[#allocation2 + $0x68] sm:$0xff] %v1641_v17 }
 0x75e   :  { %1656 = vst [vmem:[#allocation2 + $0x60] sm:$0xff] %v1601_v20 }
 0x75f   :  { %2217 = shalt.err (!%p2214_p6)
}
 0x760   :  { %s2218_s18 = scalar_lea.hbm %s2835_s20, 1792 }
 0x761   :  { %p2219_p7 = scmp.ne.s32.totalorder %s2835_s20, %s2218_s18  ;;  %p2222_p8 = scmp.lt.u32.totalorder %s2218_s18, %s2835_s20 }
 0x763   :  { %p2224_p9 = pnand %p2222_p8, %p2219_p7 }
 0x765   :  { %2227 = shalt.err (!%p2224_p9)
}
 0x766   :  { %s2240_s12 = smov 896   ;;  %s2241_s24 = smov 56  }
 0x767   :  { %1673 = dma.vmem_to_hbm [thread:$0]  %s1668_s22, 1792, %s2835_s20, [#allocation3], %s2240_s12, %s2240_s12, %s2241_s24  }
 0x768   :  { %2228 = dma.done.wait [#allocation3], 1792  }
 0x769   :  { %2229 = vsyncadd [#allocation3], 4294965504 }
 0x76a   :  { %2230 = dma.done.wait [#allocation5], 512  }
 0x76b   :  { %2231 = vsyncadd [#allocation5], 4294966784 }
 0x76c   :  { %1707 = vsyncpa [#allocation3], 1 }
 0x76d   :  { %1708 = vsyncpa [#allocation5], 1 }

</bundles_post_ra>
